<compile_context>
chip_gen: v6e
topology: v6e:2x2x1
jax: 0.10.0
libtpu: 0.0.40
codegen_flags: <defaults>
</compile_context>

<pallas_src>
import functools

import jax
import jax.numpy as jnp
from jax.experimental import pallas as pl
from jax.experimental.pallas import tpu as pltpu


def _round_up(x, m):
    return ((x + m - 1) // m) * m


SINGLE_PASS_IN_BYTES = 2 << 20   # per-instance f32 slab limit for 1-pass IN
WEIGHT_RESIDENT_BYTES = 4 << 20  # single-k if the bf16 weight block fits this


# ----------------------------------------------------------------------------
# Pallas kernels
# ----------------------------------------------------------------------------
def _mm_kernel(a_ref, b_ref, o_ref):
    """bf16 x bf16 -> f32 matmul accumulating directly into the output block."""
    @pl.when(pl.program_id(2) == 0)
    def _():
        o_ref[...] = jnp.zeros_like(o_ref)

    o_ref[...] += jnp.dot(a_ref[...], b_ref[...],
                          preferred_element_type=jnp.float32)


def _mm_bias_tanh_kernel(a_ref, b_ref, bias_ref, o_ref):
    """Matmul with fused bias + tanh epilogue on the last k step."""
    @pl.when(pl.program_id(2) == 0)
    def _():
        o_ref[...] = jnp.zeros_like(o_ref)

    o_ref[...] += jnp.dot(a_ref[...], b_ref[...],
                          preferred_element_type=jnp.float32)

    @pl.when(pl.program_id(2) == pl.num_programs(2) - 1)
    def _():
        o_ref[...] = jnp.tanh(o_ref[...] + bias_ref[...])


def _in_single_kernel(x_ref, g_ref, b_ref, *rest, relu, residual, inv_hw, eps):
    """Single-pass InstanceNorm on a VMEM-resident (1, HW, C) slab:
    mean -> centered sumsq -> normalize (+gamma/beta, ReLU, residual)."""
    if residual:
        res_ref, o_ref = rest
    else:
        (o_ref,) = rest
    x = x_ref[...].astype(jnp.float32)                      # (1, HW, C)
    m = jnp.sum(x, axis=1, keepdims=True) * inv_hw
    d = x - m
    v = jnp.sum(d * d, axis=1, keepdims=True) * inv_hw
    y = d * jax.lax.rsqrt(v + eps)
    y = y * g_ref[...] + b_ref[...]
    if relu:
        y = jnp.maximum(y, 0.0)
    if residual:
        y = y + res_ref[...].astype(jnp.float32)
    o_ref[...] = y.astype(o_ref.dtype)


# --- tiled two-pass fallback (only used when the slab does not fit VMEM) ----
def _in_stats_kernel(x_ref, mean_ref, rstd_ref, *, inv_hw, eps):
    # TODO(synk): E[x^2]-E[x]^2 over HW tiles is cancellation-prone for
    #             |mean| >> std; acceptable only for the large-image fallback.
    t = pl.program_id(1)

    @pl.when(t == 0)
    def _():
        mean_ref[...] = jnp.zeros_like(mean_ref)
        rstd_ref[...] = jnp.zeros_like(rstd_ref)

    x = x_ref[...].astype(jnp.float32)
    mean_ref[...] += jnp.sum(x, axis=1, keepdims=True)
    rstd_ref[...] += jnp.sum(x * x, axis=1, keepdims=True)

    @pl.when(t == pl.num_programs(1) - 1)
    def _():
        m = mean_ref[...] * inv_hw
        v = jnp.maximum(rstd_ref[...] * inv_hw - m * m, 0.0)
        mean_ref[...] = m
        rstd_ref[...] = jax.lax.rsqrt(v + eps)


def _in_norm_kernel(x_ref, mean_ref, rstd_ref, g_ref, b_ref, *rest,
                    relu, residual):
    if residual:
        res_ref, o_ref = rest
    else:
        (o_ref,) = rest
    y = (x_ref[...].astype(jnp.float32) - mean_ref[...]) * rstd_ref[...]
    y = y * g_ref[...] + b_ref[...]
    if relu:
        y = jnp.maximum(y, 0.0)
    if residual:
        y = y + res_ref[...].astype(jnp.float32)
    o_ref[...] = y.astype(o_ref.dtype)


# ----------------------------------------------------------------------------
# Cached pallas_call builders (one compile per unique configuration)
# ----------------------------------------------------------------------------
def _pick_k_tile(Kp, Np):
    """Single k step whenever the bf16 weight block fits; otherwise the
    largest multiple-of-128 divisor that does."""
    if Kp * Np * 2 <= WEIGHT_RESIDENT_BYTES:
        return Kp
    cap = max(128, (WEIGHT_RESIDENT_BYTES // (Np * 2)) // 128 * 128)
    for c in range(min(cap, Kp), 0, -128):
        if Kp % c == 0:
            return c
    return 128


def _choose_m_tiling(M):
    """Pad M and pick tm <= 512 (fits all generations' scoped VMEM with
    single-k bf16 A tiles); guarantee >=2 M steps so the 'parallel' axis can
    feed both v7x TensorCores."""
    if M <= 512:
        Mp = _round_up(M, 16)
        tm = Mp
    else:
        Mp = _round_up(M, 512)
        tm = 512
    if Mp // tm == 1 and Mp >= 32 and (Mp // 2) % 16 == 0:
        tm = Mp // 2
    return Mp, tm


@functools.lru_cache(maxsize=None)
def _build_matmul(Mp, Kp, Np, tm, tk, tn, fuse_bias_tanh):
    grid = (Mp // tm, Np // tn, Kp // tk)
    in_specs = [pl.BlockSpec((tm, tk), lambda i, j, k: (i, k)),
                pl.BlockSpec((tk, tn), lambda i, j, k: (k, j))]
    kern = _mm_kernel
    if fuse_bias_tanh:
        kern = _mm_bias_tanh_kernel
        in_specs.append(pl.BlockSpec((1, tn), lambda i, j, k: (0, j)))
    call = pl.pallas_call(
        kern,
        out_shape=jax.ShapeDtypeStruct((Mp, Np), jnp.float32),
        grid=grid,
        in_specs=in_specs,
        out_specs=pl.BlockSpec((tm, tn), lambda i, j, k: (i, j)),
        compiler_params=pltpu.CompilerParams(
            dimension_semantics=("parallel", "parallel", "arbitrary")),
    )
    return jax.jit(call)


@functools.lru_cache(maxsize=None)
def _build_in_single(N, HW, C, relu, residual, out_dtype):
    in_specs = [pl.BlockSpec((1, HW, C), lambda n: (n, 0, 0)),
                pl.BlockSpec((1, 1, C), lambda n: (0, 0, 0)),
                pl.BlockSpec((1, 1, C), lambda n: (0, 0, 0))]
    if residual:
        in_specs.append(pl.BlockSpec((1, HW, C), lambda n: (n, 0, 0)))
    call = pl.pallas_call(
        functools.partial(_in_single_kernel, relu=relu, residual=residual,
                          inv_hw=1.0 / HW, eps=1e-5),
        out_shape=jax.ShapeDtypeStruct((N, HW, C), out_dtype),
        grid=(N,),
        in_specs=in_specs,
        out_specs=pl.BlockSpec((1, HW, C), lambda n: (n, 0, 0)),
        compiler_params=pltpu.CompilerParams(dimension_semantics=("parallel",)),
    )
    return jax.jit(call)


def _pick_hw_tile(HW, C, target_bytes=1 << 20):
    """Largest multiple-of-8 divisor of HW whose f32 tile fits ~target_bytes
    (kept at 1 MiB so 3 streams x 2 buffers stays under v5e's 16 MiB)."""
    rows = max(8, target_bytes // (4 * C))
    if HW <= rows:
        return HW
    d = (rows // 8) * 8
    while d >= 8:
        if HW % d == 0:
            return d
        d -= 8
    return HW


@functools.lru_cache(maxsize=None)
def _build_in_stats(N, HW, C, hw_t):
    T = HW // hw_t
    call = pl.pallas_call(
        functools.partial(_in_stats_kernel, inv_hw=1.0 / HW, eps=1e-5),
        out_shape=(jax.ShapeDtypeStruct((N, 1, C), jnp.float32),
                   jax.ShapeDtypeStruct((N, 1, C), jnp.float32)),
        grid=(N, T),
        in_specs=[pl.BlockSpec((1, hw_t, C), lambda n, t: (n, t, 0))],
        out_specs=(pl.BlockSpec((1, 1, C), lambda n, t: (n, 0, 0)),
                   pl.BlockSpec((1, 1, C), lambda n, t: (n, 0, 0))),
        compiler_params=pltpu.CompilerParams(
            dimension_semantics=("parallel", "arbitrary")),
    )
    return jax.jit(call)


@functools.lru_cache(maxsize=None)
def _build_in_norm(N, HW, C, hw_t, relu, residual, out_dtype):
    T = HW // hw_t
    in_specs = [pl.BlockSpec((1, hw_t, C), lambda n, t: (n, t, 0)),
                pl.BlockSpec((1, 1, C), lambda n, t: (n, 0, 0)),
                pl.BlockSpec((1, 1, C), lambda n, t: (n, 0, 0)),
                pl.BlockSpec((1, 1, C), lambda n, t: (0, 0, 0)),
                pl.BlockSpec((1, 1, C), lambda n, t: (0, 0, 0))]
    if residual:
        in_specs.append(pl.BlockSpec((1, hw_t, C), lambda n, t: (n, t, 0)))
    call = pl.pallas_call(
        functools.partial(_in_norm_kernel, relu=relu, residual=residual),
        out_shape=jax.ShapeDtypeStruct((N, HW, C), out_dtype),
        grid=(N, T),
        in_specs=in_specs,
        out_specs=pl.BlockSpec((1, hw_t, C), lambda n, t: (n, t, 0)),
        compiler_params=pltpu.CompilerParams(
            dimension_semantics=("parallel", "parallel")),
    )
    return jax.jit(call)


# ----------------------------------------------------------------------------
# Layer wrappers
# ----------------------------------------------------------------------------
def instance_norm(x_nhwc, gamma, beta, relu, residual=None,
                  out_dtype=jnp.float32):
    """InstanceNorm2d(affine=True), eps=1e-5, per-instance statistics.
    Fuses optional ReLU / residual add; ReLU outputs are emitted in bf16."""
    N, H, W, C = x_nhwc.shape
    HW = H * W
    x2 = x_nhwc.reshape(N, HW, C)
    res2 = None if residual is None else residual.reshape(N, HW, C)

    if HW * C * 4 <= SINGLE_PASS_IN_BYTES:
        fn = _build_in_single(N, HW, C, relu, res2 is not None, out_dtype)
        args = [x2, gamma, beta] + ([] if res2 is None else [res2])
        y = fn(*args)
    else:
        hw_t = _pick_hw_tile(HW, C)
        mean, rstd = _build_in_stats(N, HW, C, hw_t)(x2)
        args = [x2, mean, rstd, gamma, beta] + ([] if res2 is None else [res2])
        y = _build_in_norm(N, HW, C, hw_t, relu, res2 is not None,
                           out_dtype)(*args)
    return y.reshape(N, H, W, C)


def conv2d(x_nhwc, wspec, bias=None, tanh=False):
    """im2col (bf16 XLA glue) + Pallas bf16 MXU matmul with optional fused
    bias+tanh epilogue.  Weight matrix is pre-transformed / padded (wspec)."""
    N, H, W, Cin = x_nhwc.shape
    kh, kw = wspec["kh"], wspec["kw"]
    stride, pad = wspec["stride"], wspec["pad"]
    Cout = wspec["cout"]
    Ho = (H + 2 * pad - kh) // stride + 1
    Wo = (W + 2 * pad - kw) // stride + 1

    xb = x_nhwc if x_nhwc.dtype == jnp.bfloat16 else x_nhwc.astype(jnp.bfloat16)
    if pad:
        xb = jnp.pad(xb, ((0, 0), (pad, pad), (pad, pad), (0, 0)))
    cols = [xb[:, i:i + stride * Ho:stride, j:j + stride * Wo:stride, :]
            for i in range(kh) for j in range(kw)]
    pat = jnp.stack(cols, axis=3).reshape(N * Ho * Wo, kh * kw * Cin)

    M, K = pat.shape
    Kp, Np = wspec["wmat"].shape
    Mp, tm = _choose_m_tiling(M)
    pat = jnp.pad(pat, ((0, Mp - M), (0, Kp - K)))

    tk = _pick_k_tile(Kp, Np)
    fn = _build_matmul(Mp, Kp, Np, tm, tk, Np, tanh)
    out = fn(pat, wspec["wmat"], bias) if tanh else fn(pat, wspec["wmat"])
    return out[:M, :Cout].reshape(N, Ho, Wo, Cout)


def conv_transpose2d(x_nhwc, wspec):
    """ConvTranspose2d(k=4, s=2, p=1) as ONE fused matmul: a shared 3x3
    stride-1 pad-1 conv whose N axis holds all four output phases
    (tn = 4*Cout), then a sub-pixel interleave to (2H, 2W)."""
    N, H, W, _ = x_nhwc.shape
    Cout = wspec["cout_phase"]
    y = conv2d(x_nhwc, wspec)                       # (N, H, W, 4*Cout)
    y = y.reshape(N, H, W, 2, 2, Cout)              # phases (rh, rw)
    y = jnp.transpose(y, (0, 1, 3, 2, 4, 5)).reshape(N, 2 * H, 2 * W, Cout)
    return y


# ----------------------------------------------------------------------------
# Parameters (PyTorch layout) + one-time preparation for the Pallas kernels
# ----------------------------------------------------------------------------
def init_params(key, res_blocks=9, img_ch=3, output_ch=3):
    def nxt():
        nonlocal key
        key, sub = jax.random.split(key)
        return sub

    def conv_w(cout, cin, k):
        return 0.05 * jax.random.normal(nxt(), (cout, cin, k, k), jnp.float32)

    def convt_w(cin, cout, k):
        return 0.05 * jax.random.normal(nxt(), (cin, cout, k, k), jnp.float32)

    def norm(c):
        g = 1.0 + 0.1 * jax.random.normal(nxt(), (c,), jnp.float32)
        b = 0.1 * jax.random.normal(nxt(), (c,), jnp.float32)
        return g, b

    p = {}
    p["conv1_w"] = conv_w(64, img_ch, 7)
    p["in1_g"], p["in1_b"] = norm(64)

    curr = 64
    p["down"] = []
    for _ in range(2):
        g, b = norm(curr * 2)
        p["down"].append({"w": conv_w(curr * 2, curr, 4), "g": g, "b": b})
        curr *= 2

    p["res"] = []
    for _ in range(res_blocks):
        g1, b1 = norm(curr)
        g2, b2 = norm(curr)
        p["res"].append({"w1": conv_w(curr, curr, 3), "g1": g1, "b1": b1,
                         "w2": conv_w(curr, curr, 3), "g2": g2, "b2": b2})

    p["up"] = []
    for _ in range(2):
        g, b = norm(curr // 2)
        p["up"].append({"w": convt_w(curr, curr // 2, 4), "g": g, "b": b})
        curr //= 2

    p["final_w"] = conv_w(output_ch, curr, 7)
    p["final_b"] = 0.1 * jax.random.normal(nxt(), (output_ch,), jnp.float32)
    return p


def _prep_conv_w(w_oihw, stride, pad):
    """PyTorch (Cout,Cin,kh,kw) -> padded bf16 (Kp, Np) matmul weight.
    Cout is always padded to 128 lanes (lane-dense output stores)."""
    Cout, Cin, kh, kw = w_oihw.shape
    K = kh * kw * Cin
    Kp = _round_up(K, 128)
    Np = _round_up(Cout, 128)
    wm = jnp.transpose(w_oihw, (2, 3, 1, 0)).reshape(K, Cout)
    wm = jnp.pad(wm, ((0, Kp - K), (0, Np - Cout))).astype(jnp.bfloat16)
    return {"wmat": wm, "kh": kh, "kw": kw, "stride": stride, "pad": pad,
            "cout": Cout}


def _prep_convT_w(w_iohw):
    """ConvTranspose2d(4,2,1) weight (Cin,Cout,4,4) -> one fused matmul weight
    of a shared 3x3 stride-1 pad-1 conv with N = 4*Cout (one column block per
    output phase).  Phase (rh,rw)'s 2x2 sub-kernel (original taps sel[rh][p],
    sel[rw][q]) is embedded at 3x3 offsets (rh+p, rw+q); unused taps are 0."""
    Cin, Cout = w_iohw.shape[:2]
    sel = ((3, 1), (2, 0))
    w9 = jnp.zeros((3, 3, Cin, 4 * Cout), jnp.float32)
    for rh in range(2):
        for rw in range(2):
            ph = 2 * rh + rw
            for p in range(2):
                for q in range(2):
                    tap = w_iohw[:, :, sel[rh][p], sel[rw][q]]   # (Cin, Cout)
                    w9 = w9.at[rh + p, rw + q, :,
                               ph * Cout:(ph + 1) * Cout].set(tap)
    K = 9 * Cin
    Kp = _round_up(K, 128)
    Np = _round_up(4 * Cout, 128)
    wm = w9.reshape(K, 4 * Cout)
    wm = jnp.pad(wm, ((0, Kp - K), (0, Np - 4 * Cout))).astype(jnp.bfloat16)
    return {"wmat": wm, "kh": 3, "kw": 3, "stride": 1, "pad": 1,
            "cout": 4 * Cout, "cout_phase": Cout}


def _prep_norm(g, b):
    C = g.shape[0]
    return (g.reshape(1, 1, C).astype(jnp.float32),
            b.reshape(1, 1, C).astype(jnp.float32))


def prepare_params(p):
    prep = {"conv1": _prep_conv_w(p["conv1_w"], 1, 3)}
    prep["in1_g"], prep["in1_b"] = _prep_norm(p["in1_g"], p["in1_b"])

    prep["down"] = []
    for blk in p["down"]:
        g, b = _prep_norm(blk["g"], blk["b"])
        prep["down"].append({"w": _prep_conv_w(blk["w"], 2, 1), "g": g, "b": b})

    prep["res"] = []
    for blk in p["res"]:
        g1, b1 = _prep_norm(blk["g1"], blk["b1"])
        g2, b2 = _prep_norm(blk["g2"], blk["b2"])
        prep["res"].append({"w1": _prep_conv_w(blk["w1"], 1, 1),
                            "w2": _prep_conv_w(blk["w2"], 1, 1),
                            "g1": g1, "b1": b1, "g2": g2, "b2": b2})

    prep["up"] = []
    for blk in p["up"]:
        g, b = _prep_norm(blk["g"], blk["b"])
        prep["up"].append({"w": _prep_convT_w(blk["w"]), "g": g, "b": b})

    final = _prep_conv_w(p["final_w"], 1, 3)
    prep["final"] = final
    Np = final["wmat"].shape[1]
    prep["final_b"] = jnp.pad(p["final_b"].reshape(1, -1).astype(jnp.float32),
                              ((0, 0), (0, Np - final["cout"])))
    return prep


# ----------------------------------------------------------------------------
# Forward pass
# ----------------------------------------------------------------------------
def generator_resnet_forward(x_nchw, prep):
    x = jnp.transpose(x_nchw.astype(jnp.float32), (0, 2, 3, 1))   # NCHW -> NHWC

    # c7s1-64
    h = conv2d(x, prep["conv1"])
    h = instance_norm(h, prep["in1_g"], prep["in1_b"], relu=True,
                      out_dtype=jnp.bfloat16)

    # two stride-2 downsampling convs; the last IN output is also the first
    # residual carry, so keep it f32 (others go straight into bf16 convs)
    n_down = len(prep["down"])
    for i, blk in enumerate(prep["down"]):
        h = conv2d(h, blk["w"])
        odt = jnp.float32 if i == n_down - 1 else jnp.bfloat16
        h = instance_norm(h, blk["g"], blk["b"], relu=True, out_dtype=odt)

    # residual blocks (skip-add fused into the second InstanceNorm)
    for blk in prep["res"]:
        r = conv2d(h, blk["w1"])
        r = instance_norm(r, blk["g1"], blk["b1"], relu=True,
                          out_dtype=jnp.bfloat16)
        r = conv2d(r, blk["w2"])
        h = instance_norm(r, blk["g2"], blk["b2"], relu=False, residual=h,
                          out_dtype=jnp.float32)

    # two fused sub-pixel transposed convs
    for blk in prep["up"]:
        h = conv_transpose2d(h, blk["w"])
        h = instance_norm(h, blk["g"], blk["b"], relu=True,
                          out_dtype=jnp.bfloat16)

    # c7s1-output_ch with bias + tanh fused into the matmul epilogue
    h = conv2d(h, prep["final"], bias=prep["final_b"], tanh=True)

    return jnp.transpose(h, (0, 3, 1, 2))                         # NHWC -> NCHW


if __name__ == "__main__":
    key = jax.random.PRNGKey(0)
    pkey, xkey = jax.random.split(key)

    params = init_params(pkey, res_blocks=9, img_ch=3, output_ch=3)
    prep = prepare_params(params)
    x = jax.random.normal(xkey, (2, 3, 16, 16), jnp.float32)      # NCHW

    out = generator_resnet_forward(x, prep)
    out = jax.block_until_ready(out)

    assert out.shape == (2, 3, 16, 16), out.shape
    assert bool(jnp.all(jnp.isfinite(out)))
    assert bool(jnp.all(jnp.abs(out) <= 1.0))                     # tanh range
    print("KERNEL_OK")
</pallas_src>

<mosaic_0001>
module attributes {stable_mosaic.version = 11 : i64} {
  func.func @_mm_kernel(%arg0: i32, %arg1: i32, %arg2: i32, %arg3: memref<256x256xbf16, #tpu.memory_space<vmem>>, %arg4: memref<256x128xbf16, #tpu.memory_space<vmem>>, %arg5: memref<256x128xf32, #tpu.memory_space<vmem>>) attributes {dimension_semantics = [#tpu.dimension_semantics<parallel>, #tpu.dimension_semantics<parallel>, #tpu.dimension_semantics<arbitrary>], iteration_bounds = array<i64: 2, 1, 1>, scalar_prefetch = 0 : i64, scratch_operands = 0 : i64, tpu.core_type = #tpu.core_type<tc>, window_params = [{transform_indices = @transform_0, window_bounds = array<i64: 256, 256>}, {transform_indices = @transform_1, window_bounds = array<i64: 256, 128>}, {transform_indices = @transform_2, window_bounds = array<i64: 256, 128>}]} {
    %c0_i32 = arith.constant 0 : i32
    %0 = arith.cmpi eq, %arg2, %c0_i32 : i32
    %1 = arith.extui %0 : i1 to i32
    %c0_i32_0 = arith.constant 0 : i32
    %2 = arith.cmpi ne, %1, %c0_i32_0 : i32
    scf.if %2 {
      %cst_8 = arith.constant 0.000000e+00 : f32
      %9 = vector.broadcast %cst_8 : f32 to vector<256x128xf32>
      %c0_9 = arith.constant 0 : index
      %c0_10 = arith.constant 0 : index
      %10 = vector.load %arg5[%c0_9, %c0_10] : memref<256x128xf32, #tpu.memory_space<vmem>>, vector<256x128xf32>
      tpu.vector_store %arg5[%c0_9, %c0_10], %9 {strides = array<i32>} : memref<256x128xf32, #tpu.memory_space<vmem>>, vector<256x128xf32>,
    } else {
    }
    %c0 = arith.constant 0 : index
    %c0_1 = arith.constant 0 : index
    %3 = vector.load %arg5[%c0, %c0_1] : memref<256x128xf32, #tpu.memory_space<vmem>>, vector<256x128xf32>
    %c0_2 = arith.constant 0 : index
    %c0_3 = arith.constant 0 : index
    %4 = vector.load %arg3[%c0_2, %c0_3] : memref<256x256xbf16, #tpu.memory_space<vmem>>, vector<256x256xbf16>
    %c0_4 = arith.constant 0 : index
    %c0_5 = arith.constant 0 : index
    %5 = vector.load %arg4[%c0_4, %c0_5] : memref<256x128xbf16, #tpu.memory_space<vmem>>, vector<256x128xbf16>
    %cst = arith.constant dense<0.000000e+00> : vector<256x128xf32>
    %6 = tpu.matmul %4, %5, %cst {dimension_numbers = #tpu.dot_dimension_numbers<[1], [0], [0], [1], [0, 0, 1, 1], [], []>} : vector<256x256xbf16>, vector<256x128xbf16>, vector<256x128xf32> -> vector<256x128xf32>
    %7 = arith.addf %3, %6 : vector<256x128xf32>
    %c0_6 = arith.constant 0 : index
    %c0_7 = arith.constant 0 : index
    %8 = vector.load %arg5[%c0_6, %c0_7] : memref<256x128xf32, #tpu.memory_space<vmem>>, vector<256x128xf32>
    tpu.vector_store %arg5[%c0_6, %c0_7], %7 {strides = array<i32>} : memref<256x128xf32, #tpu.memory_space<vmem>>, vector<256x128xf32>,
    return
  }
  func.func @transform_0(%arg0: i32, %arg1: i32, %arg2: i32) -> (i32, i32) {
    %c0_i32 = arith.constant 0 : i32
    return %arg0, %arg2 : i32, i32
  }
  func.func @transform_1(%arg0: i32, %arg1: i32, %arg2: i32) -> (i32, i32) {
    %c0_i32 = arith.constant 0 : i32
    return %arg2, %arg1 : i32, i32
  }
  func.func @transform_2(%arg0: i32, %arg1: i32, %arg2: i32) -> (i32, i32) {
    %c0_i32 = arith.constant 0 : i32
    return %arg0, %arg1 : i32, i32
  }
}

</mosaic_0001>

<bundles_post_ra>
// kernel: tpu_custom_call.1
= control target key start
LH: loop header
LB: loop body
LE: loop exit
PB: predicated region body
PF: predicated region fallthrough
CT: control target
= control target key end

     0   :  { %7 = vsyncpa [#allocation3], 0  ;;  %s1709_s0 = inlined_call_operand.hbm [shape: bf16[512,256], index: 0, kind: input, shape index: {}]   ;;  %s1710_s1 = inlined_call_operand.hbm [shape: bf16[256,128], index: 1, kind: input, shape index: {}]   ;;  %s1711_s2 = inlined_call_operand.hbm [shape: f32[512,128], index: 2, kind: output, shape index: {}]  }
   0x1   :  { %9 = vsyncpa [#allocation3 + $0x1], 0 }
   0x2   :  { %10 = vsyncpa [#allocation6], 0 }
   0x3   :  { %11 = vsyncpa [#allocation4], 0 }
   0x4   :  { %13 = vsyncpa [#allocation4 + $0x1], 0  ;;  %s1455_s9 = smov 0   ;;  %s1457_s10 = smov 0  }
   0x5   :  { %s1459_s11 = smov 0   ;;  %s1461_s12 = smov 0  }
   0x6   :  { %s1463_s13 = smov 0   ;;  %s1465_s14 = smov 0  }
   0x7 LB: > { %s950_s15 = sadd.s32 4294967295, %s1429_s14   ;;  %s951_s16 = sadd.s32 4294967294, %s1429_s14   ;;  %s1429_s14 = sphi %s1465_s14, %s19_s14   ;;  %s1425_s13 = sphi %s1463_s13, %s1729_s13   ;;  %s1421_s12 = sphi %s1461_s12, %s1728_s12   ;;  %s1417_s11 = sphi %s1459_s11, %s1727_s11   ;;  %s1413_s10 = sphi %s1457_s10, %s1726_s10   ;;  %s1409_s9 = sphi %s1455_s9, %s1725_s9  }
   0x8   : > { %p60_p0 = scmp.ne.s32.totalorder %s1413_s10, %s1409_s9  ;;  %p1489_p1 = scmp.eq.s32.totalorder %s950_s15, 0 }
   0x9   : > { %p1493_p2 = scmp.eq.s32.totalorder %s950_s15, 1  ;;  %p120_p3 = scmp.eq.s32.totalorder %s951_s16, 1 }
   0xa   : > { %p1499_p4 = por %p1489_p1, %p60_p0  ;;  %p952_p5 = scmp.ge.s32.totalorder %s1429_s14, 1 }
   0xb   : > { %p1504_p6 = por %p120_p3, %p60_p0  ;;  %p127_p7 = scmp.lt.s32.totalorder %s1429_s14, 3 }
   0xc   : > { %s1715_s19 = scalar_select %p1499_p4, 1, 0 }
   0xd   : > { %s1716_s20 = scalar_select %p1504_p6, 1, 0 }
   0xe   : > { %p1509_p8 = pnand %p952_p5, %p127_p7  ;;  %s1431_s22 = smov [#allocation5]  }
   0xf   : > { %s143_s23 = sshll.u32 %s1431_s22, 4  ;;  %s38_s25 = sadd.s32 1, %s1425_s13  ;;  %s144_s23 = int_to_ptr.vmem [resolvable:$true] %s143_s23 }
  0x10   : > { %p1155_p9 = pneg %p1509_p8  ;;  %s1302_s26 = scalar_lea.vmem %s144_s23, 2048 }
  0x11   : > { %p1303_p13 = scmp.ne.s32.totalorder %s144_s23, %s1302_s26  ;;  %p1310_p5 = scmp.lt.s32.totalorder %s144_s23, %s144_s23 }
  0x12   : > { %p1518_p11 = pnand %p1155_p9, %p1489_p1  ;;  %p1311_p7 = scmp.lt.s32.totalorder %s1302_s26, %s1302_s26 }
  0x14   : > { %p1293_p12 = pneg %p1518_p11  ;;  %p1312_p6 = por %p1311_p7, %p1310_p5 }
  0x16   : > { %p1305_p0 = pnand %p1303_p13, %p1293_p12 }
  0x18   : > { %p1306_p3 = pneg %p1305_p0 }
  0x1a   : > { %p1313_p4 = pnand %p1312_p6, %p1306_p3 }
  0x1c   : > { %1316 = shalt.err (!%p1313_p4)
}
  0x1d   : > { %s1432_s27 = smov 64   ;;  %s1433_s28 = smov 4  }
  0x1e   : > { %1158 = dma.hbm_to_vmem [thread:$0]  (!%p1518_p11), %s1710_s1, 2048, %s144_s23, [#allocation6], %s1432_s27, %s1432_s27, %s1433_s28  }
  0x1f   : > { %p40_p6 = scmp.ge.s32.totalorder %s38_s25, 2  ;;  %s47_s3 = sadd.s32 1, %s1417_s11 }
  0x20   : > { %p54_p4 = scmp.ne.s32.totalorder %s1417_s11, %s1413_s10  ;;  %p55_p9 = scmp.eq.s32.totalorder %s1429_s14, 0 }
  0x21   : > { %s1731_s25 = smov (%p40_p6, %s38_s25), 0  ;;  %p1168_p0 = scmp.lt.s32.totalorder %s1429_s14, 2 }
  0x22   : > { %p1536_p12 = por %p55_p9, %p54_p4  ;;  %p1542_p13 = por %p1493_p2, %p54_p4 }
  0x23   : > { %s42_s6 = ssub.s32 %s1425_s13, %s1731_s25  ;;  %s157_s7 = sand.u32 1, %s1417_s11  }
  0x24   : > { %p45_p11 = scmp.eq.s32.totalorder %s42_s6, 0  ;;  %s955_s8 = sshll.u32 %s157_s7, 8 }
  0x25   : > { %s1017_s16 = sshll.u32 %s1425_s13, 12  ;;  %s161_s26 = scalar_lea.vmem [#allocation2], %s955_s8 }
  0x26   : > { %s1551_s15 = scalar_select %p45_p11, %s1417_s11, %s47_s3  }
  0x27   : > { %s170_s24 = scalar_lea.hbm %s1709_s0, %s1017_s16  ;;  %s171_s27 = sshll.u32 %s161_s26, 4  ;;  %s172_s27 = int_to_ptr.vmem [resolvable:$true] %s171_s27 }
  0x28   : > { %p1559_p2 = pnand %p1168_p0, %p1536_p12  ;;  %s158_s28 = scalar_lea.sflag [#allocation3], %s157_s7 }
  0x29   : > { %s1330_s29 = scalar_lea.vmem %s172_s27, 4096  ;;  %s1434_s30 = smov [#allocation2]  }
  0x2a   : > { %p1319_p3 = pneg %p1559_p2  ;;  %p1331_p5 = scmp.ne.s32.totalorder %s172_s27, %s1330_s29 }
  0x2b   : > { %s1335_s3 = sshll.u32 %s1434_s30, 4  ;;  %s1336_s3 = int_to_ptr.vmem [resolvable:$false] %s1335_s3 }
  0x2c   : > { %p1333_p7 = pnand %p1331_p5, %p1319_p3  ;;  %s1337_s6 = scalar_lea.vmem %s1336_s3, 8192 }
  0x2d   : > { %p1338_p4 = scmp.lt.s32.totalorder %s172_s27, %s1336_s3  ;;  %p1339_p9 = scmp.lt.s32.totalorder %s1337_s6, %s1330_s29 }
  0x2e   : > { %p1334_p6 = pneg %p1333_p7 }
  0x2f   : > { %p1340_p11 = por %p1339_p9, %p1338_p4 }
  0x31   : > { %p1341_p10 = pnand %p1340_p11, %p1334_p6 }
  0x33   : > { %1344 = shalt.err (!%p1341_p10)
}
  0x34   : > { %s1435_s4 = smov 128   ;;  %s1436_s8 = smov 8  }
  0x35   : > { %1162 = dma.hbm_to_vmem [thread:$0]  (!%p1559_p2), %s170_s24, 4096, %s172_s27, %s158_s28, %s1435_s4, %s1435_s4, %s1436_s8  }
  0x36   : > { %183 = sbr.rel (%p1509_p8) target bundleno = 366 (0x16e), region = 28  ;;  %s1570_s7 = sand.u32 (!%p1509_p8), 1, %s1413_s10  }
  0x37   : > { %s960_s16 = sshll.u32 (!%p1509_p8), %s1570_s7, 8  ;;  %s186_s22 = scalar_lea.sflag (!%p1509_p8), [#allocation3], %s1570_s7 }
  0x38   : > { %s1576_s23 = scalar_lea.vmem (!%p1509_p8), [#allocation2], %s960_s16  ;;  %p1722_p10 = scmp.ne.s32.totalorder (!%p1509_p8), %s1715_s19, 0 }
  0x3b   : > { %1396 = dma.done.wait (%p1722_p10), %s186_s22, 4096  }
  0x3c   : > { %1398 = vsyncadd (%p1722_p10), %s186_s22, 4294963200 }
  0x3d   : > { %1400 = dma.done.wait (%p1489_p1), [#allocation6], 2048  }
  0x3e   : > { %1402 = vsyncadd (%p1489_p1), [#allocation6], 4294965248  ;;  %v1227_v0 = vld [vmem:[#allocation5 + $0x78] sm:$0xff]   ;;  %v1229_v2 = vld [vmem:[#allocation5 + $0x70] sm:$0xff]   ;;  %s1620_s17 = scalar_lea.vmem [#allocation7], %s960_s16  ;;  %s1018_s19 = sshll.u32 %s1421_s12, 12 }
  0x3f   : > { %v1228_v1 = vld [vmem:[#allocation5 + $0x38] sm:$0xff]   ;;  %1019 = vmatprep.subr.bf16.mxu0 %v1227_v0  ;;  %1131 = vmatprep.subr.bf16.mxu1 %v1227_v0  ;;  %v1230_v3 = vld [vmem:[#allocation5 + $0x30] sm:$0xff]   ;;  %v1231_v4 = vld [vmem:[#allocation5 + $0x68] sm:$0xff]   ;;  %s847_s21 = sshll.u32 %s1620_s17, 4  ;;  %s1657_s27 = scalar_lea.hbm %s1711_s2, %s1018_s19  ;;  %s1659_s21 = int_to_ptr.vmem [resolvable:$true] %s847_s21 }
  0x40   : > { %1020 = vmatpush3.bf16.msra.mxu0 %v1228_v1  ;;  %1139 = vmatpush3.bf16.msra.mxu1 %v1228_v1  ;;  %v1232_v5 = vld [vmem:[#allocation5 + $0x28] sm:$0xff]   ;;  %v1233_v6 = vld [vmem:[#allocation5 + $0x60] sm:$0xff]   ;;  %v1235_v8 = vld [vmem:[#allocation5 + $0x58] sm:$0xff]   ;;  %s833_s12 = scalar_lea.sflag [#allocation4], %s1570_s7  ;;  %s1345_s18 = scalar_lea.vmem %s1659_s21, 4096 }
  0x41   : > { %1021 = vmatprep.subr.bf16.mxu0 %v1229_v2  ;;  %1132 = vmatprep.subr.bf16.mxu1 %v1229_v2  ;;  %v1234_v7 = vld [vmem:[#allocation5 + $0x20] sm:$0xff]   ;;  %v1236_v9 = vld [vmem:[#allocation5 + $0x18] sm:$0xff]   ;;  %v1237_v10 = vld [vmem:[#allocation5 + $0x50] sm:$0xff]   ;;  %p1346_p1 = scmp.ne.s32.totalorder %s1659_s21, %s1345_s18  ;;  %s1437_s28 = smov [#allocation7]  }
  0x42   : > { %v1245_v11 = vld [vmem:[%s1576_s23 + $0x4] ss:$8 sps:$4 sm:$0xff]   ;;  %v1238_v13 = vld [vmem:[#allocation5 + $0x10] sm:$0xff]   ;;  %v1243_v18 = vld [vmem:[%s1576_s23] ss:$8 sps:$4 sm:$0xff]   ;;  %s1349_s29 = sshll.u32 %s1437_s28, 4  ;;  %s1350_s29 = int_to_ptr.vmem [resolvable:$false] %s1349_s29 }
  0x43   : > { %v1248_v12 = vld [vmem:[%s1576_s23 + $0x84] ss:$8 sps:$4 sm:$0xff]   ;;  %639 = vmatprep.mubr.bf16.mxu0 %v1245_v11  ;;  %v1246_v19 = vld [vmem:[%s1576_s23 + $0x80] ss:$8 sps:$4 sm:$0xff]   ;;  %v1249_v20 = vld [vmem:[%s1576_s23 + $0x14] ss:$8 sps:$4 sm:$0xff]   ;;  %p1347_p8 = pnand %p1346_p1, %p1542_p13  ;;  %p1352_p0 = scmp.lt.s32.totalorder %s1659_s21, %s1350_s29 }
  0x44   : > { %1022 = vmatpush3.bf16.msra.mxu0 %v1230_v3  ;;  %1140 = vmatpush3.bf16.msra.mxu1 %v1230_v3  ;;  %v1239_v14 = vld [vmem:[#allocation5 + $0x48] sm:$0xff]   ;;  %v1241_v16 = vld [vmem:[#allocation5 + $0x40] sm:$0xff]   ;;  %v1251_v21 = vld [vmem:[%s1576_s23 + $0x94] ss:$8 sps:$4 sm:$0xff]   ;;  %s1351_s30 = scalar_lea.vmem %s1350_s29, 8192 }
  0x45   : > { %1023 = vmatprep.subr.bf16.mxu0 %v1231_v4  ;;  %1133 = vmatprep.subr.bf16.mxu1 %v1231_v4  ;;  %v1240_v15 = vld [vmem:[#allocation5 + $0x8] sm:$0xff]   ;;  %v1242_v17 = vld [vmem:[#allocation5] sm:$0xff]   ;;  %v1253_v22 = vld [vmem:[%s1576_s23 + $0x10] ss:$8 sps:$4 sm:$0xff]   ;;  %p1348_p12 = pneg %p1347_p8  ;;  %p1353_p2 = scmp.lt.s32.totalorder %s1351_s30, %s1345_s18 }
  0x46   : > { %703 = vmatprep.mubr.bf16.mxu1 %v1248_v12  ;;  %v1254_v23 = vld [vmem:[%s1576_s23 + $0x90] ss:$8 sps:$4 sm:$0xff]   ;;  %v1255_v24 = vld [vmem:[%s1576_s23 + $0x24] ss:$8 sps:$4 sm:$0xff]   ;;  %v1259_v26 = vld [vmem:[%s1576_s23 + $0x20] ss:$8 sps:$4 sm:$0xff]  }
  0x47   : > { %v1257_v25 = vld [vmem:[%s1576_s23 + $0xa4] ss:$8 sps:$4 sm:$0xff]   ;;  %v1260_v27 = vld [vmem:[%s1576_s23 + $0xa0] ss:$8 sps:$4 sm:$0xff]   ;;  %v1261_v28 = vld [vmem:[%s1576_s23 + $0x34] ss:$8 sps:$4 sm:$0xff]   ;;  %p1354_p3 = por %p1353_p2, %p1352_p0 }
  0x48   : > { %1024 = vmatpush3.bf16.msra.mxu0 %v1232_v5  ;;  %1141 = vmatpush3.bf16.msra.mxu1 %v1232_v5  ;;  %v1263_v29 = vld [vmem:[%s1576_s23 + $0xb4] ss:$8 sps:$4 sm:$0xff]   ;;  %v1265_v30 = vld [vmem:[%s1576_s23 + $0x30] ss:$8 sps:$4 sm:$0xff]   ;;  %v1267_v32 = vld [vmem:[%s1576_s23 + $0x44] ss:$8 sps:$4 sm:$0xff]  }
  0x49   : > { %1025 = vmatprep.subr.bf16.mxu0 %v1233_v6  ;;  %1134 = vmatprep.subr.bf16.mxu1 %v1233_v6  ;;  %v1266_v31 = vld [vmem:[%s1576_s23 + $0xb0] ss:$8 sps:$4 sm:$0xff]   ;;  %v1269_v33 = vld [vmem:[%s1576_s23 + $0xc4] ss:$8 sps:$4 sm:$0xff]   ;;  %v1271_v34 = vld [vmem:[%s1576_s23 + $0x40] ss:$8 sps:$4 sm:$0xff]   ;;  %p1355_p5 = pnand %p1354_p3, %p1348_p12 }
  0x4a   : > { %v1272_v35 = vld [vmem:[%s1576_s23 + $0xc0] ss:$8 sps:$4 sm:$0xff]   ;;  %v1273_v36 = vld [vmem:[%s1576_s23 + $0x54] ss:$8 sps:$4 sm:$0xff]   ;;  %v1277_v38 = vld [vmem:[%s1576_s23 + $0x50] ss:$8 sps:$4 sm:$0xff]  }
  0x4b   : > { %v1275_v37 = vld [vmem:[%s1576_s23 + $0xd4] ss:$8 sps:$4 sm:$0xff]   ;;  %v1278_v39 = vld [vmem:[%s1576_s23 + $0xd0] ss:$8 sps:$4 sm:$0xff]   ;;  %v1279_v40 = vld [vmem:[%s1576_s23 + $0x64] ss:$8 sps:$4 sm:$0xff]  }
  0x4c   : > { %1026 = vmatpush3.bf16.msra.mxu0 %v1234_v7  ;;  %1142 = vmatpush3.bf16.msra.mxu1 %v1234_v7  ;;  %v1281_v41 = vld [vmem:[%s1576_s23 + $0xe4] ss:$8 sps:$4 sm:$0xff]   ;;  %v1283_v42 = vld [vmem:[%s1576_s23 + $0x60] ss:$8 sps:$4 sm:$0xff]   ;;  %v1285_v44 = vld [vmem:[%s1576_s23 + $0x74] ss:$8 sps:$4 sm:$0xff]  }
  0x4d   : > { %1027 = vmatprep.subr.bf16.mxu0 %v1235_v8  ;;  %1135 = vmatprep.subr.bf16.mxu1 %v1235_v8  ;;  %v1284_v43 = vld [vmem:[%s1576_s23 + $0xe0] ss:$8 sps:$4 sm:$0xff]   ;;  %v1287_v45 = vld [vmem:[%s1576_s23 + $0xf4] ss:$8 sps:$4 sm:$0xff]   ;;  %v1289_v46 = vld [vmem:[%s1576_s23 + $0x70] ss:$8 sps:$4 sm:$0xff]  }
  0x4e   : > { %v1290_v47 = vld [vmem:[%s1576_s23 + $0xf0] ss:$8 sps:$4 sm:$0xff]  }
  0x50   : > { %1028 = vmatpush3.bf16.msra.mxu0 %v1236_v9  ;;  %1143 = vmatpush3.bf16.msra.mxu1 %v1236_v9 }
  0x51   : > { %1029 = vmatprep.subr.bf16.mxu0 %v1237_v10  ;;  %1136 = vmatprep.subr.bf16.mxu1 %v1237_v10 }
  0x54   : > { %1030 = vmatpush3.bf16.msra.mxu0 %v1238_v13  ;;  %1144 = vmatpush3.bf16.msra.mxu1 %v1238_v13 }
  0x55   : > { %1031 = vmatprep.subr.bf16.mxu0 %v1239_v14  ;;  %1137 = vmatprep.subr.bf16.mxu1 %v1239_v14 }
  0x58   : > { %1032 = vmatpush3.bf16.msra.mxu0 %v1240_v15  ;;  %1145 = vmatpush3.bf16.msra.mxu1 %v1240_v15 }
  0x59   : > { %1033 = vmatprep.subr.bf16.mxu0 %v1241_v16  ;;  %1138 = vmatprep.subr.bf16.mxu1 %v1241_v16 }
  0x5c   : > { %1034 = vmatpush3.bf16.msra.mxu0 %v1242_v17  ;;  %1146 = vmatpush3.bf16.msra.mxu1 %v1242_v17 }
  0x5f   : > { %640 = vmatmul.mubr.bf16.vlgmr.msra.gmra.mxu0 %v1243_v18  ;;  %704 = vmatmul.mubr.bf16.vlgmr.msra.gmra.mxu1 %v1246_v19 }
  0x60   : > { %647 = vmatprep.mubr.bf16.mxu0 %v1249_v20  ;;  %711 = vmatprep.mubr.bf16.mxu1 %v1251_v21 }
  0x67   : > { %648 = vmatmul.mubr.bf16.gmra.mxu0 %v1253_v22  ;;  %712 = vmatmul.mubr.bf16.gmra.mxu1 %v1254_v23 }
  0x68   : > { %655 = vmatprep.mubr.bf16.mxu0 %v1255_v24  ;;  %719 = vmatprep.mubr.bf16.mxu1 %v1257_v25 }
  0x6f   : > { %656 = vmatmul.mubr.bf16.gmra.mxu0 %v1259_v26  ;;  %720 = vmatmul.mubr.bf16.gmra.mxu1 %v1260_v27 }
  0x70   : > { %663 = vmatprep.mubr.bf16.mxu0 %v1261_v28  ;;  %727 = vmatprep.mubr.bf16.mxu1 %v1263_v29 }
  0x77   : > { %664 = vmatmul.mubr.bf16.gmra.mxu0 %v1265_v30  ;;  %728 = vmatmul.mubr.bf16.gmra.mxu1 %v1266_v31 }
  0x78   : > { %671 = vmatprep.mubr.bf16.mxu0 %v1267_v32  ;;  %735 = vmatprep.mubr.bf16.mxu1 %v1269_v33 }
  0x7f   : > { %672 = vmatmul.mubr.bf16.gmra.mxu0 %v1271_v34  ;;  %736 = vmatmul.mubr.bf16.gmra.mxu1 %v1272_v35 }
  0x80   : > { %679 = vmatprep.mubr.bf16.mxu0 %v1273_v36  ;;  %743 = vmatprep.mubr.bf16.mxu1 %v1275_v37 }
  0x87   : > { %680 = vmatmul.mubr.bf16.gmra.mxu0 %v1277_v38  ;;  %744 = vmatmul.mubr.bf16.gmra.mxu1 %v1278_v39 }
  0x88   : > { %687 = vmatprep.mubr.bf16.mxu0 %v1279_v40  ;;  %751 = vmatprep.mubr.bf16.mxu1 %v1281_v41 }
  0x8f   : > { %688 = vmatmul.mubr.bf16.gmra.mxu0 %v1283_v42  ;;  %752 = vmatmul.mubr.bf16.gmra.mxu1 %v1284_v43 }
  0x90   : > { %695 = vmatprep.mubr.bf16.mxu0 %v1285_v44  ;;  %759 = vmatprep.mubr.bf16.mxu1 %v1287_v45 }
  0x97   : > { %696 = vmatmul.mubr.bf16.gmra.mxu0 %v1289_v46  ;;  %760 = vmatmul.mubr.bf16.gmra.mxu1 %v1290_v47 }
 0x11f   : > { %v1035_v48 = vpop.f32.mrf.mxu0  ;;  %v1083_v49 = vpop.f32.mrf.mxu1 }
 0x121   : > { %v1036_v50 = vpop.f32.mrf.mxu0  ;;  %v1084_v51 = vpop.f32.mrf.mxu1 }
 0x122   : > { %v1037_v52 = vadd.f32 %v1036_v50, %v1035_v48  ;;  %v1085_v53 = vadd.f32 %v1084_v51, %v1083_v49 }
 0x123   : > { %v1038_v54 = vpop.f32.mrf.mxu0  ;;  %v1086_v55 = vpop.f32.mrf.mxu1 }
 0x124   : > { %800 = vst [vmem:[%s1620_s17] sm:$0xff] %v1037_v52  ;;  %816 = vst [vmem:[%s1620_s17 + $0x80] sm:$0xff] %v1085_v53 }
 0x125   : > { %v1039_v56 = vpop.f32.mrf.mxu0  ;;  %v1087_v57 = vpop.f32.mrf.mxu1 }
 0x126   : > { %v1040_v58 = vadd.f32 %v1039_v56, %v1038_v54  ;;  %v1088_v59 = vadd.f32 %v1087_v57, %v1086_v55 }
 0x127   : > { %v1041_v60 = vpop.f32.mrf.mxu0  ;;  %v1089_v61 = vpop.f32.mrf.mxu1 }
 0x128   : > { %801 = vst [vmem:[%s1620_s17 + $0x8] sm:$0xff] %v1040_v58  ;;  %817 = vst [vmem:[%s1620_s17 + $0x88] sm:$0xff] %v1088_v59 }
 0x129   : > { %v1042_v62 = vpop.f32.mrf.mxu0  ;;  %v1090_v63 = vpop.f32.mrf.mxu1 }
 0x12a   : > { %v1043_v0 = vadd.f32 %v1042_v62, %v1041_v60  ;;  %v1091_v1 = vadd.f32 %v1090_v63, %v1089_v61 }
 0x12b   : > { %v1044_v2 = vpop.f32.mrf.mxu0  ;;  %v1092_v3 = vpop.f32.mrf.mxu1 }
 0x12c   : > { %802 = vst [vmem:[%s1620_s17 + $0x10] sm:$0xff] %v1043_v0  ;;  %818 = vst [vmem:[%s1620_s17 + $0x90] sm:$0xff] %v1091_v1 }
 0x12d   : > { %v1045_v4 = vpop.f32.mrf.mxu0  ;;  %v1093_v5 = vpop.f32.mrf.mxu1 }
 0x12e   : > { %v1046_v6 = vadd.f32 %v1045_v4, %v1044_v2  ;;  %v1094_v7 = vadd.f32 %v1093_v5, %v1092_v3 }
 0x12f   : > { %v1047_v8 = vpop.f32.mrf.mxu0  ;;  %v1095_v9 = vpop.f32.mrf.mxu1 }
 0x130   : > { %803 = vst [vmem:[%s1620_s17 + $0x18] sm:$0xff] %v1046_v6  ;;  %819 = vst [vmem:[%s1620_s17 + $0x98] sm:$0xff] %v1094_v7 }
 0x131   : > { %v1048_v10 = vpop.f32.mrf.mxu0  ;;  %v1096_v11 = vpop.f32.mrf.mxu1 }
 0x132   : > { %v1049_v12 = vadd.f32 %v1048_v10, %v1047_v8  ;;  %v1097_v13 = vadd.f32 %v1096_v11, %v1095_v9 }
 0x133   : > { %v1050_v14 = vpop.f32.mrf.mxu0  ;;  %v1098_v15 = vpop.f32.mrf.mxu1 }
 0x134   : > { %804 = vst [vmem:[%s1620_s17 + $0x20] sm:$0xff] %v1049_v12  ;;  %820 = vst [vmem:[%s1620_s17 + $0xa0] sm:$0xff] %v1097_v13 }
 0x135   : > { %v1051_v16 = vpop.f32.mrf.mxu0  ;;  %v1099_v17 = vpop.f32.mrf.mxu1 }
 0x136   : > { %v1052_v18 = vadd.f32 %v1051_v16, %v1050_v14  ;;  %v1100_v19 = vadd.f32 %v1099_v17, %v1098_v15 }
 0x137   : > { %v1053_v20 = vpop.f32.mrf.mxu0  ;;  %v1101_v21 = vpop.f32.mrf.mxu1 }
 0x138   : > { %805 = vst [vmem:[%s1620_s17 + $0x28] sm:$0xff] %v1052_v18  ;;  %821 = vst [vmem:[%s1620_s17 + $0xa8] sm:$0xff] %v1100_v19 }
 0x139   : > { %v1054_v22 = vpop.f32.mrf.mxu0  ;;  %v1102_v23 = vpop.f32.mrf.mxu1 }
 0x13a   : > { %v1055_v24 = vadd.f32 %v1054_v22, %v1053_v20  ;;  %v1103_v25 = vadd.f32 %v1102_v23, %v1101_v21 }
 0x13b   : > { %v1056_v26 = vpop.f32.mrf.mxu0  ;;  %v1104_v27 = vpop.f32.mrf.mxu1 }
 0x13c   : > { %806 = vst [vmem:[%s1620_s17 + $0x30] sm:$0xff] %v1055_v24  ;;  %822 = vst [vmem:[%s1620_s17 + $0xb0] sm:$0xff] %v1103_v25 }
 0x13d   : > { %v1057_v28 = vpop.f32.mrf.mxu0  ;;  %v1105_v29 = vpop.f32.mrf.mxu1 }
 0x13e   : > { %v1058_v30 = vadd.f32 %v1057_v28, %v1056_v26  ;;  %v1106_v31 = vadd.f32 %v1105_v29, %v1104_v27 }
 0x13f   : > { %v1059_v32 = vpop.f32.mrf.mxu0  ;;  %v1107_v33 = vpop.f32.mrf.mxu1 }
 0x140   : > { %807 = vst [vmem:[%s1620_s17 + $0x38] sm:$0xff] %v1058_v30  ;;  %823 = vst [vmem:[%s1620_s17 + $0xb8] sm:$0xff] %v1106_v31 }
 0x141   : > { %v1060_v34 = vpop.f32.mrf.mxu0  ;;  %v1108_v35 = vpop.f32.mrf.mxu1 }
 0x142   : > { %v1061_v36 = vadd.f32 %v1060_v34, %v1059_v32  ;;  %v1109_v37 = vadd.f32 %v1108_v35, %v1107_v33 }
 0x143   : > { %v1062_v38 = vpop.f32.mrf.mxu0  ;;  %v1110_v39 = vpop.f32.mrf.mxu1 }
 0x144   : > { %808 = vst [vmem:[%s1620_s17 + $0x40] sm:$0xff] %v1061_v36  ;;  %824 = vst [vmem:[%s1620_s17 + $0xc0] sm:$0xff] %v1109_v37 }
 0x145   : > { %v1063_v40 = vpop.f32.mrf.mxu0  ;;  %v1111_v41 = vpop.f32.mrf.mxu1 }
 0x146   : > { %v1064_v42 = vadd.f32 %v1063_v40, %v1062_v38  ;;  %v1112_v43 = vadd.f32 %v1111_v41, %v1110_v39 }
 0x147   : > { %v1065_v44 = vpop.f32.mrf.mxu0  ;;  %v1113_v45 = vpop.f32.mrf.mxu1 }
 0x148   : > { %809 = vst [vmem:[%s1620_s17 + $0x48] sm:$0xff] %v1064_v42  ;;  %825 = vst [vmem:[%s1620_s17 + $0xc8] sm:$0xff] %v1112_v43 }
 0x149   : > { %v1066_v46 = vpop.f32.mrf.mxu0  ;;  %v1114_v47 = vpop.f32.mrf.mxu1 }
 0x14a   : > { %v1067_v48 = vadd.f32 %v1066_v46, %v1065_v44  ;;  %v1115_v49 = vadd.f32 %v1114_v47, %v1113_v45 }
 0x14b   : > { %v1068_v50 = vpop.f32.mrf.mxu0  ;;  %v1116_v51 = vpop.f32.mrf.mxu1 }
 0x14c   : > { %810 = vst [vmem:[%s1620_s17 + $0x50] sm:$0xff] %v1067_v48  ;;  %826 = vst [vmem:[%s1620_s17 + $0xd0] sm:$0xff] %v1115_v49 }
 0x14d   : > { %v1069_v52 = vpop.f32.mrf.mxu0  ;;  %v1117_v53 = vpop.f32.mrf.mxu1 }
 0x14e   : > { %v1070_v54 = vadd.f32 %v1069_v52, %v1068_v50  ;;  %v1118_v55 = vadd.f32 %v1117_v53, %v1116_v51 }
 0x14f   : > { %v1071_v56 = vpop.f32.mrf.mxu0  ;;  %v1119_v57 = vpop.f32.mrf.mxu1 }
 0x150   : > { %811 = vst [vmem:[%s1620_s17 + $0x58] sm:$0xff] %v1070_v54  ;;  %827 = vst [vmem:[%s1620_s17 + $0xd8] sm:$0xff] %v1118_v55 }
 0x151   : > { %v1072_v58 = vpop.f32.mrf.mxu0  ;;  %v1120_v59 = vpop.f32.mrf.mxu1 }
 0x152   : > { %v1073_v60 = vadd.f32 %v1072_v58, %v1071_v56  ;;  %v1121_v61 = vadd.f32 %v1120_v59, %v1119_v57 }
 0x153   : > { %v1074_v62 = vpop.f32.mrf.mxu0  ;;  %v1122_v63 = vpop.f32.mrf.mxu1 }
 0x154   : > { %812 = vst [vmem:[%s1620_s17 + $0x60] sm:$0xff] %v1073_v60  ;;  %828 = vst [vmem:[%s1620_s17 + $0xe0] sm:$0xff] %v1121_v61 }
 0x155   : > { %v1075_v0 = vpop.f32.mrf.mxu0  ;;  %v1123_v1 = vpop.f32.mrf.mxu1 }
 0x156   : > { %v1076_v2 = vadd.f32 %v1075_v0, %v1074_v62  ;;  %v1124_v3 = vadd.f32 %v1123_v1, %v1122_v63 }
 0x157   : > { %v1077_v4 = vpop.f32.mrf.mxu0  ;;  %v1125_v5 = vpop.f32.mrf.mxu1 }
 0x158   : > { %813 = vst [vmem:[%s1620_s17 + $0x68] sm:$0xff] %v1076_v2  ;;  %829 = vst [vmem:[%s1620_s17 + $0xe8] sm:$0xff] %v1124_v3 }
 0x159   : > { %v1078_v6 = vpop.f32.mrf.mxu0  ;;  %v1126_v7 = vpop.f32.mrf.mxu1 }
 0x15a   : > { %v1079_v8 = vadd.f32 %v1078_v6, %v1077_v4  ;;  %v1127_v9 = vadd.f32 %v1126_v7, %v1125_v5 }
 0x15b   : > { %v1080_v10 = vpop.f32.mrf.mxu0  ;;  %v1128_v11 = vpop.f32.mrf.mxu1 }
 0x15c   : > { %814 = vst [vmem:[%s1620_s17 + $0x70] sm:$0xff] %v1079_v8  ;;  %830 = vst [vmem:[%s1620_s17 + $0xf0] sm:$0xff] %v1127_v9 }
 0x15d   : > { %v1081_v12 = vpop.f32.mrf.mxu0  ;;  %v1129_v13 = vpop.f32.mrf.mxu1 }
 0x15e   : > { %v1082_v14 = vadd.f32 %v1081_v12, %v1080_v10  ;;  %v1130_v15 = vadd.f32 %v1129_v13, %v1128_v11 }
 0x160   : > { %815 = vst [vmem:[%s1620_s17 + $0x78] sm:$0xff] %v1082_v14  ;;  %831 = vst [vmem:[%s1620_s17 + $0xf8] sm:$0xff] %v1130_v15 }
 0x161   : > { %1358 = shalt.err (!%p1355_p5)
}
 0x162   : > { %s1359_s3 = scalar_lea.hbm %s1657_s27, 4096  ;;  %s1363_s8 = scalar_lea.hbm %s1711_s2, 8192 }
 0x163   : > { %p1360_p7 = scmp.ne.s32.totalorder %s1657_s27, %s1359_s3  ;;  %p1364_p9 = scmp.lt.s32.totalorder %s1657_s27, %s1711_s2 }
 0x164   : > { %p1365_p11 = scmp.lt.s32.totalorder %s1363_s8, %s1359_s3 }
 0x165   : > { %p1361_p6 = pnand %p1360_p7, %p1542_p13 }
 0x166   : > { %p1366_p10 = por %p1365_p11, %p1364_p9 }
 0x167   : > { %p1362_p4 = pneg %p1361_p6 }
 0x169   : > { %p1367_p1 = pnand %p1366_p10, %p1362_p4 }
 0x16b   : > { %1370 = shalt.err (!%p1367_p1)
}
 0x16c   : > { %s1438_s23 = smov 128   ;;  %s1439_s17 = smov 8  }
 0x16d   : > { %1153 = dma.vmem_to_hbm [thread:$0]  (%p1542_p13), %s1659_s21, 4096, %s1657_s27, %s833_s12, %s1438_s23, %s1438_s23, %s1439_s17  }
 0x16e PF: > { %s862_s19 = sand.u32 1, %s1409_s9   ;;  %p1723_p8 = scmp.ne.s32.totalorder %s1716_s20, 0 }
 0x16f   : > { %p1724_p12 = scmp.ge.s32.totalorder %s1429_s14, 2  ;;  %s863_s24 = scalar_lea.sflag [#allocation4], %s862_s19 }
 0x171   : > { %p1164_p0 = pnand %p1724_p12, %p1723_p8 }
 0x173   : > { %p1165_p2 = pneg %p1164_p0 }
 0x175   : > { %1404 = dma.done.wait (%p1165_p2), %s863_s24, 4096  }
 0x176   : > { %1406 = vsyncadd (%p1165_p2), %s863_s24, 4294963200  ;;  %s19_s14 = sadd.s32 1, %s1429_s14   ;;  %s1725_s9 = smov %s1413_s10 }
 0x177   : > { %p16_p3 = scmp.ge.s32.totalorder %s19_s14, 4   ;;  %s1726_s10 = smov %s1417_s11 }
 0x178   : > { %s1727_s11 = smov %s1551_s15  ;;  %s1728_s12 = smov %s1425_s13 }
 0x179   : > { %s1729_s13 = smov %s1731_s25  ;;  %18 = sbr.rel (!%p16_p3) target bundleno = 7 (0x7), region = 82 }
 0x17e   :  { %868 = vsyncpa [#allocation3], 1 }
 0x17f   :  { %870 = vsyncpa [#allocation3 + $0x1], 1 }
 0x180   :  { %871 = vsyncpa [#allocation6], 1 }
 0x181   :  { %872 = vsyncpa [#allocation4], 1 }
 0x182   :  { %874 = vsyncpa [#allocation4 + $0x1], 1 }

</bundles_post_ra>
